<compile_context>
chip_gen: v7x
topology: tpu7x:2x2x1
jax: 0.10.0
libtpu: 0.0.40
codegen_flags: <defaults>
</compile_context>

<pallas_src>
import jax
import jax.numpy as jnp
from jax.experimental import pallas as pl
from jax.experimental.pallas import tpu as pltpu


# --------------------------------------------------------------------------- #
# Graph preprocessing helpers (plain-JAX glue; irregular per-edge scalar work). #
# TODO(synk): lly_curvature_limit_free / cfl_delta_t / ricci_flow_half_step /  #
# metric_surgery / row_normalise / laplacian / incident_curvature /            #
# curvature_gate are imported-but-not-shown in the reference source; the       #
# versions below are reasonable stand-ins with identical signatures & shapes.  #
# --------------------------------------------------------------------------- #
def lly_curvature_limit_free(edge_index, num_nodes, edge_weight, combinatorial_only=False):
    row, col = edge_index[0], edge_index[1]
    deg = jnp.zeros((num_nodes,), jnp.float32).at[row].add(jnp.ones_like(edge_weight))
    # degree-based curvature proxy (limit-free LLY-style lower bound, no triangles)
    return 2.0 / deg[row] + 2.0 / deg[col] - 2.0


def cfl_delta_t(kappa, edge_weight, safety=0.9):
    return safety * jnp.min(edge_weight) / (jnp.max(jnp.abs(kappa)) + 1e-6)


def ricci_flow_half_step(edge_weight, kappa, delta_t):
    return edge_weight * (1.0 - 0.5 * delta_t * kappa)


def metric_surgery(edge_index, w_half, eps=1e-6):
    # TODO(synk): true metric surgery drops collapsed edges (dynamic shape);
    # static-shape equivalent: keep edge_index, zero out collapsed weights.
    return edge_index, jnp.where(w_half > eps, w_half, 0.0)


def row_normalise(edge_index, w, num_nodes):
    row = edge_index[0]
    deg = jnp.zeros((num_nodes,), jnp.float32).at[row].add(w)
    return w / jnp.maximum(deg[row], 1e-12)


def laplacian(edge_index, w_norm, num_nodes):
    # per-edge off-diagonal entries of the random-walk Laplacian I - D^{-1} W
    return -w_norm


def incident_curvature(edge_index, kappa, num_nodes):
    row = edge_index[0]
    s = jnp.zeros((num_nodes,), jnp.float32).at[row].add(kappa)
    c = jnp.zeros((num_nodes,), jnp.float32).at[row].add(jnp.ones_like(kappa))
    return s / jnp.maximum(c, 1.0)


def curvature_gate(mean_kappa):
    return jax.nn.sigmoid(mean_kappa)


def cgmp_preprocess(edge_index, edge_weight, num_nodes):
    """Curvature / Ricci-flow / Laplacian pipeline (edge-wise scalar work)."""
    kappa = lly_curvature_limit_free(edge_index, num_nodes, edge_weight)
    dt = cfl_delta_t(kappa, edge_weight)
    w_half = ricci_flow_half_step(edge_weight, kappa, dt)
    edge_index_new, w_half = metric_surgery(edge_index, w_half)
    w_norm = row_normalise(edge_index_new, w_half, num_nodes)
    lap_vals = laplacian(edge_index_new, w_norm, num_nodes)
    minus_L = -lap_vals
    mean_kappa = incident_curvature(edge_index_new, kappa, num_nodes)
    rho = curvature_gate(mean_kappa)
    return edge_index_new, w_norm, minus_L, rho


# --------------------------------------------------------------------------- #
# Pallas kernel.                                                               #
#   k == 0      : out = (rho*X)_i @ Ws^T + tau * h0_i        (f32, resident)   #
#   every k     : out += A[i,k] @ XWn_k                      (f32 accumulate)  #
# Grid = (row tiles [parallel], K tiles [arbitrary, last]).                    #
# --------------------------------------------------------------------------- #
def _cgmp_kernel(tau_ref, a_ref, xwn_ref, xs_ref, wsT_ref, h0_ref, out_ref):
    k = pl.program_id(1)

    @pl.when(k == 0)
    def _init():
        h_self = jnp.dot(xs_ref[...], wsT_ref[...],
                         preferred_element_type=jnp.float32)
        out_ref[...] = h_self + tau_ref[0] * h0_ref[...].astype(jnp.float32)

    # Neighbor aggregation accumulated directly into the resident f32 output.
    out_ref[...] += jnp.dot(a_ref[...], xwn_ref[...],
                            preferred_element_type=jnp.float32)


def _round_up(x, m):
    return ((x + m - 1) // m) * m


def _pick_row_tile(n, target=1024):
    """Row tile: multiple of 8, near-balanced split, >= 2 tiles when possible
    so the 'parallel' axis can shard across v7x's 2 TensorCores."""
    steps = max(2, -(-n // target)) if n > 8 else 1
    return max(8, _round_up(-(-n // steps), 8))


def _pick_k_tile(n, target=2048):
    """K tile: multiple of 128, near-balanced split (keeps zero-padding small)."""
    steps = max(1, -(-n // target))
    return max(128, _round_up(-(-n // steps), 128))


def _vmem_limit_bytes(tile_n, tile_k, c):
    bf, f32, dbl = 2, 4, 2          # bf16 bytes, f32 bytes, double-buffer factor
    total = (
        dbl * tile_n * tile_k * bf      # A row/K tile
        + dbl * tile_k * c * bf         # XWn K tile
        + dbl * tile_n * c * bf         # (rho*X) self tile
        + dbl * c * c * bf              # Ws^T (grid-invariant)
        + dbl * tile_n * c * bf         # h0 tile
        + dbl * tile_n * c * f32        # f32 output tile (resident accumulator)
    )
    want = 2 * total + (8 << 20)        # generous headroom for compiler scratch
    # Generation-aware cap: never exceed physical VMEM (v7x has only 64 MiB/TC).
    cap = 56 << 20
    try:
        info = pltpu.get_tpu_info()
        cap = int(getattr(info, "vmem_capacity_bytes", cap)) - (8 << 20)
    except Exception:
        pass
    cap = max(cap, 32 << 20)
    return int(min(max(want, 32 << 20), cap))


def cgmp_forward(x, edge_index, w_self, w_neigh, tau, edge_weight=None, h0=None,
                 tile_n=None, tile_k=None):
    """Pallas-accelerated CGMP layer forward. Returns (out, edge_index_new, w_norm)."""
    N, C_in = x.shape
    C_out = w_self.shape[0]
    assert C_in == C_out, "configured with in_channels == out_channels (no adapter)"
    C = C_out

    if edge_weight is None:                       # no_edge_weights branch
        edge_weight = jnp.ones((edge_index.shape[1],), jnp.float32)
    if h0 is None:                                # first forward: h0 buffer <- x
        h0 = x

    edge_index_new, w_norm, minus_L, rho = cgmp_preprocess(edge_index, edge_weight, N)

    if tile_n is None:
        tile_n = _pick_row_tile(N)
    if tile_k is None:
        tile_k = _pick_k_tile(N)
    assert tile_n % 8 == 0, tile_n
    assert tile_k % 128 == 0, tile_k

    Nr = _round_up(N, tile_n)                     # padded rows
    Nk = _round_up(N, tile_k)                     # padded contraction dim
    pad_r, pad_k = Nr - N, Nk - N

    # Dense propagation operator, built directly in bf16 at the padded shape
    # (avoids the f32 N^2 write + separate cast pass over HBM).
    # TODO(synk): for E << N^2 replace this densification with a scalar-prefetch
    # padded-neighbor / CSR gather kernel (pattern P2).
    row, col = edge_index_new[0], edge_index_new[1]
    a_bf = jnp.zeros((Nr, Nk), jnp.bfloat16).at[row, col].add(
        minus_L.astype(jnp.bfloat16))

    # XWn precomputed once (f32 matmul, then bf16 for the MXU K stream).
    xwn_bf = jnp.pad(x @ w_neigh.T, ((0, pad_k), (0, 0))).astype(jnp.bfloat16)
    # Curvature gate folded into the self operand: rho * (X @ Ws^T) == (rho*X) @ Ws^T.
    xs_bf = jnp.pad(rho[:, None] * x, ((0, pad_r), (0, 0))).astype(jnp.bfloat16)
    h0_bf = jnp.pad(h0, ((0, pad_r), (0, 0))).astype(jnp.bfloat16)
    wsT_bf = w_self.T.astype(jnp.bfloat16)        # (C_in, C_out)
    tau_arr = jnp.asarray([tau], jnp.float32)     # scalar prefetch (SMEM)

    grid = (Nr // tile_n, Nk // tile_k)

    # TODO(synk): once C >= 512, use pipeline_mode=pl.Buffered(1) on the
    # grid-invariant Ws^T block to drop its second buffer (v7x VMEM budget).
    grid_spec = pltpu.PrefetchScalarGridSpec(
        num_scalar_prefetch=1,
        grid=grid,
        in_specs=[
            pl.BlockSpec((tile_n, tile_k), lambda i, k, tau_r: (i, k)),   # A tile
            pl.BlockSpec((tile_k, C),      lambda i, k, tau_r: (k, 0)),   # XWn K tile
            pl.BlockSpec((tile_n, C),      lambda i, k, tau_r: (i, 0)),   # (rho*X) tile
            pl.BlockSpec((C, C),           lambda i, k, tau_r: (0, 0)),   # Ws^T
            pl.BlockSpec((tile_n, C),      lambda i, k, tau_r: (i, 0)),   # h0 tile
        ],
        out_specs=pl.BlockSpec((tile_n, C), lambda i, k, tau_r: (i, 0)),
    )

    out = pl.pallas_call(
        _cgmp_kernel,
        out_shape=jax.ShapeDtypeStruct((Nr, C), jnp.float32),
        grid_spec=grid_spec,
        compiler_params=pltpu.CompilerParams(
            dimension_semantics=("parallel", "arbitrary"),
            vmem_limit_bytes=_vmem_limit_bytes(tile_n, tile_k, C),
        ),
    )(tau_arr, a_bf, xwn_bf, xs_bf, wsT_bf, h0_bf)

    return out[:N], edge_index_new, w_norm


# --------------------------------------------------------------------------- #
if __name__ == "__main__":
    key = jax.random.PRNGKey(0)

    def build_graph(N):
        # small undirected graph: ring + next-nearest neighbours + a few hub edges
        src, dst = [], []
        for i in range(N):
            for d in (1, 2):
                j = (i + d) % N
                src += [i, j]
                dst += [j, i]
        for j in (5, 9, 13):
            src += [0, j]
            dst += [j, 0]
        return jnp.asarray([src, dst], dtype=jnp.int32)            # [2, E]

    def run_case(N, C, tile_n=None, tile_k=None):
        k_x, k_ws, k_wn = jax.random.split(jax.random.fold_in(key, N), 3)
        x = jax.random.normal(k_x, (N, C), jnp.float32)
        # deterministic nn.Linear-style init: U(-1/sqrt(fan_in), 1/sqrt(fan_in)), bias=False
        lim = 1.0 / (C ** 0.5)
        w_self = jax.random.uniform(k_ws, (C, C), jnp.float32, -lim, lim)   # [out, in]
        w_neigh = jax.random.uniform(k_wn, (C, C), jnp.float32, -lim, lim)  # [out, in]
        edge_index = build_graph(N)
        tau = 0.1   # fixed teleport weight (module built with tau=0.1)

        out, ei_new, w_norm = cgmp_forward(x, edge_index, w_self, w_neigh, tau,
                                           tile_n=tile_n, tile_k=tile_k)
        out = jax.block_until_ready(out)

        # -------- pure-JAX reference (mirrors the PyTorch scatter_add path) ----
        edge_weight = jnp.ones((edge_index.shape[1],), jnp.float32)
        _, _, minus_L, rho = cgmp_preprocess(edge_index, edge_weight, N)
        h_self_ref = x @ w_self.T
        h_neigh_ref = x @ w_neigh.T
        row, col = ei_new[0], ei_new[1]
        msg = minus_L[:, None] * h_neigh_ref[col]
        neigh_ref = jnp.zeros((N, C), jnp.float32).at[row].add(msg)
        out_ref = rho[:, None] * h_self_ref + neigh_ref + tau * x            # h0 == x

        assert out.shape == (N, C)
        assert bool(jnp.all(jnp.isfinite(out)))
        max_err = float(jnp.max(jnp.abs(out - out_ref)))
        # bf16 MXU operands with f32 accumulation (no intermediate downcast)
        assert bool(jnp.allclose(out, out_ref, rtol=3e-2, atol=3e-2)), max_err

    # auto tiles: 2 row tiles (megacore-shardable), single K step
    run_case(64, 128)
    # non-divisible N: exercises zero-padding of rows/cols + result slicing
    run_case(200, 128)
    # 2x2 grid: parallel row tiles + K-tiled resident-output f32 accumulation
    run_case(256, 128, tile_n=128, tile_k=128)

    print("KERNEL_OK")
</pallas_src>

<mosaic_0001>
module attributes {stable_mosaic.version = 11 : i64} {
  func.func @_cgmp_kernel(%arg0: i32, %arg1: i32, %arg2: memref<1xf32, #tpu.memory_space<smem>>, %arg3: memref<32x128xbf16, #tpu.memory_space<vmem>>, %arg4: memref<128x128xbf16, #tpu.memory_space<vmem>>, %arg5: memref<32x128xbf16, #tpu.memory_space<vmem>>, %arg6: memref<128x128xbf16, #tpu.memory_space<vmem>>, %arg7: memref<32x128xbf16, #tpu.memory_space<vmem>>, %arg8: memref<32x128xf32, #tpu.memory_space<vmem>>) attributes {dimension_semantics = [#tpu.dimension_semantics<parallel>, #tpu.dimension_semantics<arbitrary>], iteration_bounds = array<i64: 2, 1>, scalar_prefetch = 1 : i64, scratch_operands = 0 : i64, tpu.core_type = #tpu.core_type<tc>, window_params = [{transform_indices = @transform_0, window_bounds = array<i64: 32, 128>}, {transform_indices = @transform_1, window_bounds = array<i64: 128, 128>}, {transform_indices = @transform_2, window_bounds = array<i64: 32, 128>}, {pipeline_mode = #tpu.pipeline_mode<synchronous>, transform_indices = @transform_3, window_bounds = array<i64: 128, 128>}, {transform_indices = @transform_4, window_bounds = array<i64: 32, 128>}, {transform_indices = @transform_5, window_bounds = array<i64: 32, 128>}]} {
    %c0_i32 = arith.constant 0 : i32
    %0 = arith.cmpi eq, %arg1, %c0_i32 : i32
    %1 = arith.extui %0 : i1 to i32
    %c0_i32_0 = arith.constant 0 : i32
    %2 = arith.cmpi ne, %1, %c0_i32_0 : i32
    scf.if %2 {
      %c0_8 = arith.constant 0 : index
      %c0_9 = arith.constant 0 : index
      %9 = vector.load %arg5[%c0_8, %c0_9] : memref<32x128xbf16, #tpu.memory_space<vmem>>, vector<32x128xbf16>
      %c0_10 = arith.constant 0 : index
      %c0_11 = arith.constant 0 : index
      %10 = vector.load %arg6[%c0_10, %c0_11] : memref<128x128xbf16, #tpu.memory_space<vmem>>, vector<128x128xbf16>
      %cst_12 = arith.constant dense<0.000000e+00> : vector<32x128xf32>
      %11 = tpu.matmul %9, %10, %cst_12 {dimension_numbers = #tpu.dot_dimension_numbers<[1], [0], [0], [1], [0, 0, 1, 1], [], []>} : vector<32x128xbf16>, vector<128x128xbf16>, vector<32x128xf32> -> vector<32x128xf32>
      %c0_13 = arith.constant 0 : index
      %12 = memref.load %arg2[%c0_13] : memref<1xf32, #tpu.memory_space<smem>>
      %c0_14 = arith.constant 0 : index
      %c0_15 = arith.constant 0 : index
      %13 = vector.load %arg7[%c0_14, %c0_15] : memref<32x128xbf16, #tpu.memory_space<vmem>>, vector<32x128xbf16>
      %14 = arith.extf %13 : vector<32x128xbf16> to vector<32x128xf32>
      %15 = vector.broadcast %12 : f32 to vector<32x128xf32>
      %16 = arith.mulf %15, %14 : vector<32x128xf32>
      %17 = arith.addf %11, %16 : vector<32x128xf32>
      %c0_16 = arith.constant 0 : index
      %c0_17 = arith.constant 0 : index
      %18 = vector.load %arg8[%c0_16, %c0_17] : memref<32x128xf32, #tpu.memory_space<vmem>>, vector<32x128xf32>
      tpu.vector_store %arg8[%c0_16, %c0_17], %17 {strides = array<i32>} : memref<32x128xf32, #tpu.memory_space<vmem>>, vector<32x128xf32>,
    } else {
    }
    %c0 = arith.constant 0 : index
    %c0_1 = arith.constant 0 : index
    %3 = vector.load %arg8[%c0, %c0_1] : memref<32x128xf32, #tpu.memory_space<vmem>>, vector<32x128xf32>
    %c0_2 = arith.constant 0 : index
    %c0_3 = arith.constant 0 : index
    %4 = vector.load %arg3[%c0_2, %c0_3] : memref<32x128xbf16, #tpu.memory_space<vmem>>, vector<32x128xbf16>
    %c0_4 = arith.constant 0 : index
    %c0_5 = arith.constant 0 : index
    %5 = vector.load %arg4[%c0_4, %c0_5] : memref<128x128xbf16, #tpu.memory_space<vmem>>, vector<128x128xbf16>
    %cst = arith.constant dense<0.000000e+00> : vector<32x128xf32>
    %6 = tpu.matmul %4, %5, %cst {dimension_numbers = #tpu.dot_dimension_numbers<[1], [0], [0], [1], [0, 0, 1, 1], [], []>} : vector<32x128xbf16>, vector<128x128xbf16>, vector<32x128xf32> -> vector<32x128xf32>
    %7 = arith.addf %3, %6 : vector<32x128xf32>
    %c0_6 = arith.constant 0 : index
    %c0_7 = arith.constant 0 : index
    %8 = vector.load %arg8[%c0_6, %c0_7] : memref<32x128xf32, #tpu.memory_space<vmem>>, vector<32x128xf32>
    tpu.vector_store %arg8[%c0_6, %c0_7], %7 {strides = array<i32>} : memref<32x128xf32, #tpu.memory_space<vmem>>, vector<32x128xf32>,
    return
  }
  func.func @transform_0(%arg0: i32, %arg1: i32, %arg2: memref<1xf32, #tpu.memory_space<smem>>) -> (i32, i32) {
    %c0_i32 = arith.constant 0 : i32
    return %arg0, %arg1 : i32, i32
  }
  func.func @transform_1(%arg0: i32, %arg1: i32, %arg2: memref<1xf32, #tpu.memory_space<smem>>) -> (i32, i32) {
    %c0_i32 = arith.constant 0 : i32
    %c0_i32_0 = arith.constant 0 : i32
    return %arg1, %c0_i32 : i32, i32
  }
  func.func @transform_2(%arg0: i32, %arg1: i32, %arg2: memref<1xf32, #tpu.memory_space<smem>>) -> (i32, i32) {
    %c0_i32 = arith.constant 0 : i32
    %c0_i32_0 = arith.constant 0 : i32
    return %arg0, %c0_i32 : i32, i32
  }
  func.func @transform_3(%arg0: i32, %arg1: i32, %arg2: memref<1xf32, #tpu.memory_space<smem>>) -> (i32, i32) {
    %c0_i32 = arith.constant 0 : i32
    %c0_i32_0 = arith.constant 0 : i32
    %c0_i32_1 = arith.constant 0 : i32
    return %c0_i32, %c0_i32_0 : i32, i32
  }
  func.func @transform_4(%arg0: i32, %arg1: i32, %arg2: memref<1xf32, #tpu.memory_space<smem>>) -> (i32, i32) {
    %c0_i32 = arith.constant 0 : i32
    %c0_i32_0 = arith.constant 0 : i32
    return %arg0, %c0_i32 : i32, i32
  }
  func.func @transform_5(%arg0: i32, %arg1: i32, %arg2: memref<1xf32, #tpu.memory_space<smem>>) -> (i32, i32) {
    %c0_i32 = arith.constant 0 : i32
    %c0_i32_0 = arith.constant 0 : i32
    return %arg0, %c0_i32 : i32, i32
  }
}

</mosaic_0001>

<bundles_post_ra>
// kernel: tpu_custom_call.1
= control target key start
LH: loop header
LB: loop body
LE: loop exit
PB: predicated region body
PF: predicated region fallthrough
CT: control target
= control target key end

     0   :  { %s1760_s0 = inlined_call_operand.<no memory space> [shape: f32[1], index: 0, kind: input, shape index: {}]   ;;  %s1761_s1 = inlined_call_operand.hbm [shape: bf16[64,128], index: 1, kind: input, shape index: {}]   ;;  %s1762_s2 = inlined_call_operand.hbm [shape: bf16[128,128], index: 2, kind: input, shape index: {}]   ;;  %s1763_s3 = inlined_call_operand.hbm [shape: bf16[64,128], index: 3, kind: input, shape index: {}]   ;;  %s1764_s4 = inlined_call_operand.hbm [shape: bf16[128,128], index: 4, kind: input, shape index: {}]   ;;  %s1765_s5 = inlined_call_operand.hbm [shape: bf16[64,128], index: 5, kind: input, shape index: {}]   ;;  %s1766_s6 = inlined_call_operand.hbm [shape: f32[64,128], index: 6, kind: output, shape index: {}]  }
   0x1   :  { %1787 = sst [smem:[#allocation24_spill]] %s1761_s1 }
   0x2   :  { %1788 = sst [smem:[#allocation25_spill]] %s1762_s2 }
   0x3   :  { %11 = sst [smem:[#allocation3]] %s1760_s0 }
   0x4   :  { %12 = vsyncpa [#allocation5], 0 }
   0x5   :  { %14 = vsyncpa [#allocation5 + $0x1], 0 }
   0x6   :  { %15 = vsyncpa [#allocation8], 0 }
   0x7   :  { %16 = vsyncpa [#allocation12], 0 }
   0x8   :  { %18 = vsyncpa [#allocation12 + $0x1], 0 }
   0x9   :  { %19 = vsyncpa [#allocation6], 0 }
   0xa   :  { %21 = vsyncpa [#allocation6 + $0x1], 0  ;;  %s1380_s23 = smov 0   ;;  %s1382_s24 = smov 0  }
   0xb   :  { %s1384_s25 = smov 0   ;;  %s1386_s26 = smov 0  }
   0xc   :  { %s1388_s27 = smov 0   ;;  %s1390_s28 = smov 0  }
   0xd LB: > { %1789 = sst [smem:[#allocation20_spill]] %s1310_s23  ;;  %s1411_s0 = sadd.s32 4294967295, %s1330_s28   ;;  %s1330_s28 = sphi %s1390_s28, %s27_s28   ;;  %s1326_s27 = sphi %s1388_s27, %s1826_s27   ;;  %s1322_s26 = sphi %s1386_s26, %s1825_s26   ;;  %s1318_s25 = sphi %s1384_s25, %s1829_s25   ;;  %s1314_s24 = sphi %s1382_s24, %s1828_s24   ;;  %s1310_s23 = sphi %s1380_s23, %s1827_s23  }
   0xe   : > { %1790 = sst [smem:[#allocation21_spill]] %s1326_s27  ;;  %s834_s29 = sadd.s32 4294967294, %s1330_s28  }
   0xf   : > { %p55_p0 = scmp.ne.s32.totalorder %s1318_s25, %s1314_s24  ;;  %p56_p1 = scmp.eq.s32.totalorder %s1330_s28, 0 }
  0x10   : > { %p61_p2 = scmp.ne.s32.totalorder %s1314_s24, %s1310_s23  ;;  %p1767_p3 = scmp.eq.s32.totalorder %s1411_s0, 0 }
  0x11   : > { %p1420_p4 = por %p56_p1, %p55_p0  ;;  %p184_p5 = scmp.eq.s32.totalorder %s1411_s0, 1 }
  0x12   : > { %p1427_p6 = por %p1767_p3, %p61_p2  ;;  %p190_p7 = scmp.eq.s32.totalorder %s834_s29, 1 }
  0x13   : > { %p1431_p8 = por %p184_p5, %p55_p0  ;;  %p835_p9 = scmp.ge.s32.totalorder %s1330_s28, 1 }
  0x14   : > { %s1792_s7 = scalar_select %p1427_p6, 1, 0 }
  0x15   : > { %s1793_s8 = scalar_select %p1431_p8, 1, 0 }
  0x16   : > { %p1436_p10 = por %p190_p7, %p61_p2  ;;  %p197_p11 = scmp.lt.s32.totalorder %s1330_s28, 3 }
  0x17   : > { %s1332_s11 = smov [#allocation7]   ;;  %s39_s14 = sadd.s32 1, %s1326_s27 }
  0x18   : > { %s1794_s9 = scalar_select %p1436_p10, 1, 0 }
  0x19   : > { %p1441_p12 = pnand %p835_p9, %p197_p11  ;;  %s212_s12 = sshll.u32 %s1332_s11, 4  ;;  %s1445_s12 = int_to_ptr.vmem [resolvable:$true] %s212_s12 }
  0x1a   : > { %1795 = sst [smem:[#allocation22_spill]] %s1794_s9  ;;  %p1458_p2 = scmp.ge.s32.totalorder %s39_s14, 2 }
  0x1b   : > { %s1796_s10 = scalar_select %p1441_p12, 1, 0 }
  0x1c   : > { %p985_p13 = pneg %p1441_p12  ;;  %s1799_s2 = sld [smem:[#allocation25_spill]] }
  0x1e   : > { %p1452_p1 = pnand %p985_p13, %p1767_p3 }
  0x20   : > { %s1797_s13 = scalar_select %p1452_p1, 1, 0 }
  0x21   : > { %p1779_p7 = pneg %p1452_p1 }
  0x22   : > { %s1086_s19 = scalar_lea.hbm %s1799_s2, 1024 }
  0x23   : > { %p1087_p5 = scmp.ne.s32.totalorder %s1799_s2, %s1086_s19  ;;  %p1093_p13 = scmp.lt.u32.totalorder %s1086_s19, %s1799_s2 }
  0x25   : > { %p1089_p9 = pnand %p1779_p7, %p1087_p5 }
  0x27   : > { %p1090_p11 = pneg %p1089_p9 }
  0x29   : > { %p1095_p0 = pnand %p1093_p13, %p1090_p11 }
  0x2b   : > { %1098 = shalt.err (!%p1095_p0)
}
  0x2c   : > { %s1099_s11 = scalar_lea.vmem %s1445_s12, 1024  ;;  %p1107_p6 = scmp.lt.s32.totalorder %s1445_s12, %s1445_s12 }
  0x2d   : > { %p1100_p3 = scmp.ne.s32.totalorder %s1445_s12, %s1099_s11  ;;  %p1108_p5 = scmp.lt.s32.totalorder %s1099_s11, %s1099_s11 }
  0x2f   : > { %p1102_p10 = pnand %p1100_p3, %p1779_p7  ;;  %p1109_p9 = por %p1108_p5, %p1107_p6 }
  0x31   : > { %p1103_p8 = pneg %p1102_p10 }
  0x33   : > { %p1110_p12 = pnand %p1109_p9, %p1103_p8 }
  0x35   : > { %1113 = shalt.err (!%p1110_p12)
}
  0x36   : > { %s1774_s17 = smov 64   ;;  %s1776_s18 = smov 4  }
  0x37   : > { %988 = dma.hbm_to_vmem [thread:$0]  (!%p1452_p1), %s1799_s2, 1024, %s1445_s12, [#allocation8], %s1774_s17, %s1774_s17, %s1776_s18  }
  0x38   : > { %s1831_s14 = smov (%p1458_p2, %s39_s14), 0  ;;  %p1008_p3 = scmp.lt.s32.totalorder %s1330_s28, 2 }
  0x39   : > { %1800 = sst [smem:[#allocation23_spill]] %s1831_s14  ;;  %s239_s21 = sand.u32 1, %s1330_s28  }
  0x3a   : > { %s43_s22 = ssub.s32 %s1326_s27, %s1831_s14  ;;  %s1773_s29 = sand.u32 1, %s1318_s25  }
  0x3b   : > { %p46_p6 = scmp.eq.s32.totalorder %s43_s22, 0  ;;  %s1503_s11 = sshll.u32 %s1773_s29, 4 }
  0x3c   : > { %s1506_s15 = sshll.u32 %s1326_s27, 8  ;;  %s1801_s9 = sadd.s32 1, %s1318_s25 }
  0x3d   : > { %s1511_s23 = scalar_select %p46_p6, %s1318_s25, %s1801_s9  }
  0x3e   : > { %s1802_s1 = sld [smem:[#allocation24_spill]]  ;;  %s243_s20 = scalar_lea.vmem [#allocation4], %s1503_s11 }
  0x3f   : > { %s251_s22 = sshll.u32 %s243_s20, 4  ;;  %p1522_p8 = pnand %p1008_p3, %p1420_p4  ;;  %s1526_s22 = int_to_ptr.vmem [resolvable:$true] %s251_s22 }
  0x40   : > { %s1335_s9 = smov [#allocation10]   ;;  %s1530_s12 = scalar_lea.sflag [#allocation5], %s239_s21 }
  0x41   : > { %s1803_s29 = scalar_select %p1522_p8, 1, 0 }
  0x42   : > { %s1528_s17 = sshll.u32 %s1335_s9, 4  ;;  %p1536_p12 = pneg %p1522_p8  ;;  %s226_s17 = int_to_ptr.vmem [resolvable:$true] %s1528_s17 }
  0x44   : > { %s1517_s19 = scalar_lea.hbm %s1802_s1, %s1506_s15  ;;  %s1119_s2 = scalar_lea.hbm %s1802_s1, 512 }
  0x45   : > { %s1114_s16 = scalar_lea.hbm %s1517_s19, 256  ;;  %p1120_p2 = scmp.lt.u32.totalorder %s1517_s19, %s1802_s1 }
  0x46   : > { %p1115_p10 = scmp.ne.s32.totalorder %s1517_s19, %s1114_s16  ;;  %p1121_p11 = scmp.lt.u32.totalorder %s1119_s2, %s1114_s16 }
  0x47   : > { %s1804_s18 = scalar_select %p1536_p12, 1, 0 }
  0x48   : > { %p1117_p4 = pnand %p1536_p12, %p1115_p10  ;;  %p1122_p13 = por %p1121_p11, %p1120_p2 }
  0x49   : > { %p1123_p5 = scmp.lt.u32.totalorder %s1114_s16, %s1517_s19 }
  0x4a   : > { %p1118_p0 = pneg %p1117_p4 }
  0x4b   : > { %p1124_p9 = por %p1123_p5, %p1122_p13 }
  0x4d   : > { %p1125_p3 = pnand %p1124_p9, %p1118_p0 }
  0x4f   : > { %1128 = shalt.err (!%p1125_p3)
}
  0x50   : > { %s1129_s21 = scalar_lea.vmem %s1526_s22, 256  ;;  %s1336_s30 = smov [#allocation4]  }
  0x51   : > { %p1130_p6 = scmp.ne.s32.totalorder %s1526_s22, %s1129_s21  ;;  %s1134_s20 = sshll.u32 %s1336_s30, 4  ;;  %s1135_s20 = int_to_ptr.vmem [resolvable:$false] %s1134_s20 }
  0x52   : > { %s1136_s14 = scalar_lea.vmem %s1135_s20, 512  ;;  %p1137_p7 = scmp.lt.s32.totalorder %s1526_s22, %s1135_s20 }
  0x53   : > { %p1132_p10 = pnand %p1130_p6, %p1536_p12  ;;  %p1138_p1 = scmp.lt.s32.totalorder %s1136_s14, %s1129_s21 }
  0x55   : > { %p1133_p4 = pneg %p1132_p10  ;;  %p1139_p2 = por %p1138_p1, %p1137_p7 }
  0x57   : > { %p1140_p11 = pnand %p1139_p2, %p1133_p4 }
  0x59   : > { %1143 = shalt.err (!%p1140_p11)
}
  0x5a   : > { %s1805_s2 = smov 4   ;;  %s1806_s16 = smov 64  }
  0x5b   : > { %995 = dma.hbm_to_vmem [thread:$0]  (!%p1522_p8), %s1517_s19, 256, %s1526_s22, %s1530_s12, %s1806_s16, %s1806_s16, %s1805_s2  }
  0x5c   : > { %s1144_s20 = scalar_lea.hbm %s1764_s4, 1024  ;;  %p1807_p7 = scmp.ne.s32.totalorder %s1797_s13, 0 }
  0x5d   : > { %p1145_p1 = scmp.ne.s32.totalorder %s1764_s4, %s1144_s20  ;;  %p1151_p9 = scmp.lt.u32.totalorder %s1144_s20, %s1764_s4 }
  0x5e   : > { %p1808_p0 = pneg %p1807_p7 }
  0x60   : > { %p1147_p13 = pnand %p1145_p1, %p1808_p0 }
  0x62   : > { %p1148_p5 = pneg %p1147_p13 }
  0x64   : > { %p1153_p3 = pnand %p1151_p9, %p1148_p5 }
  0x66   : > { %1156 = shalt.err (!%p1153_p3)
}
  0x67   : > { %s1157_s19 = scalar_lea.vmem %s226_s17, 1024  ;;  %p1809_p10 = pmov %p1808_p0 }
  0x68   : > { %p1158_p6 = scmp.ne.s32.totalorder %s226_s17, %s1157_s19  ;;  %p1165_p11 = scmp.lt.s32.totalorder %s226_s17, %s226_s17 }
  0x69   : > { %p1166_p8 = scmp.lt.s32.totalorder %s1157_s19, %s1157_s19 }
  0x6a   : > { %p1160_p4 = pnand %p1158_p6, %p1809_p10 }
  0x6b   : > { %p1167_p12 = por %p1166_p8, %p1165_p11 }
  0x6c   : > { %p1161_p2 = pneg %p1160_p4 }
  0x6e   : > { %p1168_p0 = pnand %p1167_p12, %p1161_p2 }
  0x70   : > { %1171 = shalt.err (!%p1168_p0)
}
  0x71   : > { %991 = dma.hbm_to_vmem [thread:$0]  (!%p1807_p7), %s1764_s4, 1024, %s226_s17, [#allocation8], %s1806_s16, %s1806_s16, %s1805_s2  }
  0x72   : > { %s1591_s30 = scalar_lea.hbm %s1763_s3, %s1506_s15  ;;  %s265_s13 = scalar_lea.vmem [#allocation9], %s1503_s11 }
  0x73   : > { %s272_s20 = sshll.u32 %s265_s13, 4  ;;  %s1172_s21 = scalar_lea.hbm %s1591_s30, 256  ;;  %s1594_s20 = int_to_ptr.vmem [resolvable:$true] %s272_s20 }
  0x74   : > { %p1173_p8 = scmp.ne.s32.totalorder %s1591_s30, %s1172_s21  ;;  %p1810_p12 = scmp.ne.s32.totalorder %s1804_s18, 0 }
  0x75   : > { %s1177_s19 = scalar_lea.hbm %s1763_s3, 512  ;;  %p1178_p7 = scmp.lt.u32.totalorder %s1591_s30, %s1763_s3 }
  0x76   : > { %p1175_p1 = pnand %p1173_p8, %p1810_p12  ;;  %p1179_p5 = scmp.lt.u32.totalorder %s1177_s19, %s1172_s21 }
  0x77   : > { %p1181_p3 = scmp.lt.u32.totalorder %s1172_s21, %s1591_s30 }
  0x78   : > { %p1176_p13 = pneg %p1175_p1  ;;  %p1180_p9 = por %p1179_p5, %p1178_p7 }
  0x7a   : > { %p1182_p6 = por %p1181_p3, %p1180_p9 }
  0x7c   : > { %p1183_p10 = pnand %p1182_p6, %p1176_p13 }
  0x7e   : > { %1186 = shalt.err (!%p1183_p10)
}
  0x7f   : > { %s1187_s22 = scalar_lea.vmem %s1594_s20, 256  ;;  %s1337_s9 = smov [#allocation9]  }
  0x80   : > { %p1188_p4 = scmp.ne.s32.totalorder %s1594_s20, %s1187_s22  ;;  %s1192_s13 = sshll.u32 %s1337_s9, 4  ;;  %s1193_s13 = int_to_ptr.vmem [resolvable:$false] %s1192_s13 }
  0x81   : > { %s1194_s14 = scalar_lea.vmem %s1193_s13, 512  ;;  %p1195_p0 = scmp.lt.s32.totalorder %s1594_s20, %s1193_s13 }
  0x82   : > { %p1190_p2 = pnand %p1188_p4, %p1810_p12  ;;  %p1196_p8 = scmp.lt.s32.totalorder %s1194_s14, %s1187_s22 }
  0x84   : > { %p1191_p11 = pneg %p1190_p2  ;;  %p1197_p1 = por %p1196_p8, %p1195_p0 }
  0x86   : > { %p1198_p7 = pnand %p1197_p1, %p1191_p11 }
  0x88   : > { %1201 = shalt.err (!%p1198_p7)
}
  0x89   : > { %p1811_p13 = scmp.ne.s32.totalorder %s1803_s29, 0  ;;  %s1625_s19 = scalar_lea.hbm %s1765_s5, %s1506_s15 }
  0x8a   : > { %s286_s1 = scalar_lea.vmem [#allocation11], %s1503_s11  ;;  %s1812_s22 = sand.u32 1, %s1318_s25  }
  0x8b   : > { %998 = dma.hbm_to_vmem [thread:$0]  (!%p1811_p13), %s1591_s30, 256, %s1594_s20, %s1530_s12, %s1806_s16, %s1806_s16, %s1805_s2  }
  0x8c   : > { %s293_s27 = sshll.u32 %s286_s1, 4  ;;  %s1632_s9 = scalar_lea.sflag [#allocation12], %s1812_s22  ;;  %s1628_s27 = int_to_ptr.vmem [resolvable:$true] %s293_s27 }
  0x8d   : > { %s1202_s13 = scalar_lea.hbm %s1625_s19, 256  ;;  %s1207_s15 = scalar_lea.hbm %s1765_s5, 512 }
  0x8e   : > { %p1203_p5 = scmp.ne.s32.totalorder %s1625_s19, %s1202_s13  ;;  %p1208_p6 = scmp.lt.u32.totalorder %s1625_s19, %s1765_s5 }
  0x8f   : > { %p1209_p10 = scmp.lt.u32.totalorder %s1207_s15, %s1202_s13  ;;  %p1211_p2 = scmp.lt.u32.totalorder %s1202_s13, %s1625_s19 }
  0x90   : > { %p1205_p9 = pnand %p1203_p5, %p1810_p12 }
  0x91   : > { %p1210_p4 = por %p1209_p10, %p1208_p6 }
  0x92   : > { %p1206_p3 = pneg %p1205_p9 }
  0x93   : > { %p1212_p11 = por %p1211_p2, %p1210_p4 }
  0x95   : > { %p1213_p0 = pnand %p1212_p11, %p1206_p3 }
  0x97   : > { %1216 = shalt.err (!%p1213_p0)
}
  0x98   : > { %s1217_s11 = scalar_lea.vmem %s1628_s27, 256  ;;  %s1338_s21 = smov [#allocation11]  }
  0x99   : > { %p1218_p8 = scmp.ne.s32.totalorder %s1628_s27, %s1217_s11  ;;  %s1222_s17 = sshll.u32 %s1338_s21, 4  ;;  %s1223_s17 = int_to_ptr.vmem [resolvable:$false] %s1222_s17 }
  0x9a   : > { %s1224_s1 = scalar_lea.vmem %s1223_s17, 512  ;;  %p1225_p5 = scmp.lt.s32.totalorder %s1628_s27, %s1223_s17 }
  0x9b   : > { %p1220_p1 = pnand %p1218_p8, %p1810_p12  ;;  %p1226_p9 = scmp.lt.s32.totalorder %s1224_s1, %s1217_s11 }
  0x9d   : > { %p1221_p7 = pneg %p1220_p1  ;;  %p1227_p6 = por %p1226_p9, %p1225_p5 }
  0x9f   : > { %p1228_p10 = pnand %p1227_p6, %p1221_p7 }
  0xa1   : > { %1231 = shalt.err (!%p1228_p10)
}
  0xa2   : > { %1001 = dma.hbm_to_vmem [thread:$0]  (!%p1811_p13), %s1625_s19, 256, %s1628_s27, %s1632_s9, %s1806_s16, %s1806_s16, %s1805_s2  }
  0xa3   : > { %p1813_p12 = scmp.ne.s32.totalorder %s1796_s10, 0 }
  0xa4   : > { %s307_s18 = sand.u32 (!%p1813_p12), 1, %s1411_s0   ;;  %s1663_s22 = sand.u32 (!%p1813_p12), 1, %s1314_s24  }
  0xa5   : > { %305 = sbr.rel (%p1813_p12) target bundleno = 452 (0x1c4), region = 40  ;;  %s1666_s13 = sshll.u32 (!%p1813_p12), %s1663_s22, 4 }
  0xa6   : > { %s308_s29 = scalar_lea.sflag (!%p1813_p12), [#allocation5], %s307_s18  ;;  %s311_s12 = scalar_lea.vmem (!%p1813_p12), [#allocation4], %s1666_s13 }
  0xa7   : > { %p1814_p3 = scmp.ne.s32.totalorder (!%p1813_p12), %s1792_s7, 0 }
  0xac   : > { %1285 = dma.done.wait (%p1814_p3), %s308_s29, 256  }
  0xad   : > { %1287 = vsyncadd (%p1814_p3), %s308_s29, 4294967040  ;;  %p1815_p13 = scmp.eq.s32.totalorder %s1411_s0, 0 }
  0xaf   : > { %1289 = dma.done.wait (%p1815_p13), [#allocation8], 1024   ;;  %p1816_p4 = pmov %p1815_p13 }
  0xb0   : > { %s324_s10 = scalar_lea.vmem [#allocation9], %s1666_s13 }
  0xb1   : > { %1291 = vsyncadd (%p1816_p4), [#allocation8], 4294966272 }
  0xb2   : > { %1293 = dma.done.wait (%p1814_p3), %s308_s29, 256  }
  0xb3   : > { %1295 = vsyncadd (%p1814_p3), %s308_s29, 4294967040  ;;  %p1817_p2 = pmov %p1816_p4 }
  0xb5   : > { %1297 = dma.done.wait (%p1817_p2), [#allocation8], 1024   ;;  %p1818_p11 = pmov %p1817_p2 }
  0xb6   : > { %s334_s2 = scalar_lea.sflag [#allocation12], %s1663_s22  ;;  %s337_s16 = scalar_lea.vmem [#allocation11], %s1666_s13 }
  0xb7   : > { %1299 = vsyncadd (%p1818_p11), [#allocation8], 4294966272 }
  0xb8   : > { %1301 = dma.done.wait (%p1814_p3), %s334_s2, 256  }
  0xb9   : > { %1303 = vsyncadd (%p1814_p3), %s334_s2, 4294967040  ;;  %v1066_v0 = vld [vmem:[#allocation10] sm:$0xff]   ;;  %v1067_v1 = vld [vmem:[#allocation10 + $0x8] sm:$0xff]   ;;  %s404_s0 = sld [smem:[#allocation3]]  ;;  %s854_s7 = sshll.u32 %s1663_s22, 5 }
  0xba   : > { %913 = vmatprep.subr.bf16.mxu1 %v1066_v0  ;;  %v1068_v2 = vld [vmem:[#allocation7] sm:$0xff]   ;;  %v1069_v3 = vld [vmem:[#allocation10 + $0x10] sm:$0xff]   ;;  %v1070_v4 = vld [vmem:[#allocation7 + $0x8] sm:$0xff]   ;;  %s883_s19 = sshll.u32 %s1322_s26, 9  ;;  %s373_s27 = scalar_lea.vmem [#allocation13], %s854_s7 }
  0xbb   : > { %914 = vmatpush3.bf16.msra.mxu1 %v1066_v0  ;;  %933 = vmatprep.subr.bf16.mxu0 %v1068_v2  ;;  %v1072_v5 = vld [vmem:[#allocation7 + $0x10] sm:$0xff]   ;;  %v1071_v6 = vld [vmem:[#allocation10 + $0x18] sm:$0xff]   ;;  %v1073_v8 = vld [vmem:[#allocation10 + $0x20] sm:$0xff]   ;;  %s686_s9 = sshll.u32 %s373_s27, 4  ;;  %s1709_s20 = scalar_lea.hbm %s1766_s6, %s883_s19  ;;  %s1711_s9 = int_to_ptr.vmem [resolvable:$true] %s686_s9 }
  0xbc   : > { %915 = vmatprep.subr.bf16.mxu1 %v1067_v1  ;;  %934 = vmatpush3.bf16.msra.mxu0 %v1068_v2  ;;  %v1074_v7 = vld [vmem:[#allocation7 + $0x18] sm:$0xff]   ;;  %v1076_v9 = vld [vmem:[#allocation7 + $0x20] sm:$0xff]   ;;  %v1075_v11 = vld [vmem:[#allocation10 + $0x28] sm:$0xff]   ;;  %s673_s26 = scalar_lea.sflag [#allocation6], %s1663_s22  ;;  %s1232_s14 = scalar_lea.vmem %s1711_s9, 512 }
  0xbd   : > { %935 = vmatprep.subr.bf16.mxu0 %v1070_v4  ;;  %v1080_v10 = vld [vmem:[%s324_s10] sm:$0xff]   ;;  %v1078_v12 = vld [vmem:[#allocation7 + $0x28] sm:$0xff]   ;;  %v1079_v16 = vld [vmem:[#allocation10 + $0x38] sm:$0xff]   ;;  %p1233_p0 = scmp.ne.s32.totalorder %s1711_s9, %s1232_s14  ;;  %p1819_p8 = scmp.ne.s32.totalorder %s1793_s8, 0 }
  0xbe   : > { %929 = vmatprep.mubr.bf16.mxu1 %v1080_v10  ;;  %v1084_v13 = vld [vmem:[%s311_s12] sm:$0xff]   ;;  %v1083_v17 = vld [vmem:[#allocation7 + $0x38] sm:$0xff]   ;;  %s1339_s11 = smov [#allocation13]  }
  0xbf   : > { %916 = vmatpush3.bf16.msra.mxu1 %v1067_v1  ;;  %v1077_v14 = vld [vmem:[#allocation10 + $0x30] sm:$0xff]   ;;  %949 = vmatprep.mubr.bf16.mxu0 %v1084_v13  ;;  %v1082_v18 = vld [vmem:[%s324_s10 + $0x8] sm:$0xff]   ;;  %v413_v23 = vstv %s404_s0  ;;  %p1234_p1 = pnand %p1233_p0, %p1819_p8  ;;  %s1236_s21 = sshll.u32 %s1339_s11, 4  ;;  %s1237_s21 = int_to_ptr.vmem [resolvable:$false] %s1236_s21 }
  0xc0   : > { %917 = vmatprep.subr.bf16.mxu1 %v1069_v3  ;;  %936 = vmatpush3.bf16.msra.mxu0 %v1070_v4  ;;  %v1081_v15 = vld [vmem:[#allocation7 + $0x30] sm:$0xff]   ;;  %v1085_v19 = vld [vmem:[%s311_s12 + $0x8] sm:$0xff]   ;;  %s1238_s17 = scalar_lea.vmem %s1237_s21, 1024  ;;  %p1239_p5 = scmp.lt.s32.totalorder %s1711_s9, %s1237_s21 }
  0xc1   : > { %937 = vmatprep.subr.bf16.mxu0 %v1072_v5  ;;  %v892_v20 = vld [vmem:[%s337_s16 + $0x8] sm:$0xff]   ;;  %v885_v21 = vld [vmem:[%s337_s16] sm:$0xff]   ;;  %p1235_p7 = pneg %p1234_p1  ;;  %p1240_p9 = scmp.lt.s32.totalorder %s1238_s17, %s1232_s14 }
  0xc2   : > { %v890_v22 = vunpack.c.l.bf16 %v892_v20  ;;  %v886_v24 = vunpack.c.l.bf16 %v885_v21  ;;  %v891_v25 = vunpack.c.h.bf16 %v892_v20  ;;  %v887_v26 = vunpack.c.h.bf16 %v885_v21 }
  0xc3   : > { %918 = vmatpush3.bf16.msra.mxu1 %v1069_v3  ;;  %p1241_p6 = por %p1240_p9, %p1239_p5 }
  0xc4   : > { %919 = vmatprep.subr.bf16.mxu1 %v1071_v6  ;;  %938 = vmatpush3.bf16.msra.mxu0 %v1072_v5  ;;  %v416_v27 = vmul.f32 %v890_v22, %v413_v23  ;;  %v414_v28 = vmul.f32 %v886_v24, %v413_v23  ;;  %v417_v29 = vmul.f32 %v891_v25, %v413_v23 }
  0xc5   : > { %939 = vmatprep.subr.bf16.mxu0 %v1074_v7  ;;  %v415_v31 = vmul.f32 %v887_v26, %v413_v23  ;;  %p1242_p10 = pnand %p1241_p6, %p1235_p7 }
  0xc7   : > { %920 = vmatpush3.bf16.msra.mxu1 %v1071_v6 }
  0xc8   : > { %921 = vmatprep.subr.bf16.mxu1 %v1073_v8  ;;  %940 = vmatpush3.bf16.msra.mxu0 %v1074_v7 }
  0xc9   : > { %941 = vmatprep.subr.bf16.mxu0 %v1076_v9 }
  0xcb   : > { %922 = vmatpush3.bf16.msra.mxu1 %v1073_v8 }
  0xcc   : > { %923 = vmatprep.subr.bf16.mxu1 %v1075_v11  ;;  %942 = vmatpush3.bf16.msra.mxu0 %v1076_v9 }
  0xcd   : > { %943 = vmatprep.subr.bf16.mxu0 %v1078_v12 }
  0xcf   : > { %924 = vmatpush3.bf16.msra.mxu1 %v1075_v11 }
  0xd0   : > { %925 = vmatprep.subr.bf16.mxu1 %v1077_v14  ;;  %944 = vmatpush3.bf16.msra.mxu0 %v1078_v12 }
  0xd1   : > { %945 = vmatprep.subr.bf16.mxu0 %v1081_v15 }
  0xd3   : > { %926 = vmatpush3.bf16.msra.mxu1 %v1077_v14 }
  0xd4   : > { %927 = vmatprep.subr.bf16.mxu1 %v1079_v16  ;;  %946 = vmatpush3.bf16.msra.mxu0 %v1081_v15 }
  0xd5   : > { %947 = vmatprep.subr.bf16.mxu0 %v1083_v17 }
  0xd7   : > { %928 = vmatpush3.bf16.msra.mxu1 %v1079_v16 }
  0xd8   : > { %948 = vmatpush3.bf16.msra.mxu0 %v1083_v17 }
  0xda   : > { %930 = vmatmul.mubr.bf16.vlgmr.msra.gmra.mrb[0].mxu1 %v1082_v18 }
  0xdb   : > { %950 = vmatmul.mubr.bf16.vlgmr.msra.gmra.mrb[0].mxu0 %v1085_v19 }
 0x1ad   : > { %v931_v30 = vpop.f32.mrb[0].mxu1 }
 0x1ae   : > { %v521_v32 = vadd.f32 %v931_v30, %v416_v27  ;;  %v512_v33 = vpop.f32.mrb[1].mxu1  ;;  %v951_v36 = vpop.f32.mrb[0].mxu0 }
 0x1af   : > { %v513_v34 = vadd.f32 %v512_v33, %v414_v28  ;;  %v932_v35 = vpop.f32.mrb[2].mxu1  ;;  %v649_v40 = vpop.f32.mrb[1].mxu0 }
 0x1b0   : > { %v524_v37 = vadd.f32 %v932_v35, %v417_v29  ;;  %v515_v38 = vpop.f32.mrb[3].mxu1  ;;  %v956_v39 = vadd.f32 %v951_v36, %v521_v32  ;;  %v952_v43 = vpop.f32.mrb[2].mxu0 }
 0x1b1   : > { %v516_v41 = vadd.f32 %v515_v38, %v415_v31  ;;  %v960_v42 = vadd.f32 %v649_v40, %v513_v34  ;;  %v652_v45 = vpop.f32.mrb[3].mxu0 }
 0x1b2   : > { %670 = vst [vmem:[%s373_s27 + $0x10] sm:$0xff] %v956_v39  ;;  %v964_v44 = vadd.f32 %v952_v43, %v524_v37 }
 0x1b3   : > { %668 = vst [vmem:[%s373_s27] sm:$0xff] %v960_v42  ;;  %v968_v46 = vadd.f32 %v652_v45, %v516_v41 }
 0x1b4   : > { %671 = vst [vmem:[%s373_s27 + $0x18] sm:$0xff] %v964_v44 }
 0x1b5   : > { %669 = vst [vmem:[%s373_s27 + $0x8] sm:$0xff] %v968_v46 }
 0x1b6   : > { %1245 = shalt.err (!%p1242_p10)
}
 0x1b7   : > { %s1246_s1 = scalar_lea.hbm %s1709_s20, 512  ;;  %s1250_s29 = scalar_lea.hbm %s1766_s6, 1024 }
 0x1b8   : > { %p1247_p12 = scmp.ne.s32.totalorder %s1709_s20, %s1246_s1  ;;  %p1251_p4 = scmp.lt.u32.totalorder %s1709_s20, %s1766_s6 }
 0x1b9   : > { %p1252_p2 = scmp.lt.u32.totalorder %s1250_s29, %s1246_s1  ;;  %p1254_p0 = scmp.lt.u32.totalorder %s1246_s1, %s1709_s20 }
 0x1ba   : > { %p1248_p3 = pnand %p1247_p12, %p1819_p8 }
 0x1bb   : > { %p1253_p11 = por %p1252_p2, %p1251_p4 }
 0x1bc   : > { %p1249_p13 = pneg %p1248_p3 }
 0x1bd   : > { %p1255_p1 = por %p1254_p0, %p1253_p11 }
 0x1bf   : > { %p1256_p7 = pnand %p1255_p1, %p1249_p13 }
 0x1c1   : > { %1259 = shalt.err (!%p1256_p7)
}
 0x1c2   : > { %s1340_s2 = smov 128   ;;  %s1341_s16 = smov 8  }
 0x1c3   : > { %983 = dma.vmem_to_hbm [thread:$0]  (%p1819_p8), %s1711_s9, 512, %s1709_s20, %s673_s26, %s1340_s2, %s1340_s2, %s1341_s16  }
 0x1c4 PF: > { %s1820_s0 = sld [smem:[#allocation20_spill]]  ;;  %s1821_s7 = sld [smem:[#allocation22_spill]] }
 0x1c5   : > { %p1823_p9 = scmp.ge.s32.totalorder %s1330_s28, 2 }
 0x1ca   : > { %s701_s19 = sand.u32 1, %s1820_s0   ;;  %p1822_p5 = scmp.ne.s32.totalorder %s1821_s7, 0 }
 0x1cb   : > { %s702_s27 = scalar_lea.sflag [#allocation6], %s701_s19 }
 0x1cc   : > { %p1003_p6 = pnand %p1823_p9, %p1822_p5 }
 0x1ce   : > { %1305 = dma.done.wait (!%p1003_p6), %s702_s27, 512  }
 0x1cf   : > { %1307 = vsyncadd (!%p1003_p6), %s702_s27, 4294966784  ;;  %s27_s28 = sadd.s32 1, %s1330_s28   ;;  %s1824_s30 = smov %s1511_s23 }
 0x1d0   : > { %p24_p10 = scmp.ge.s32.totalorder %s27_s28, 4   ;;  %s1825_s26 = sld [smem:[#allocation21_spill]] }
 0x1d1   : > { %s1826_s27 = sld [smem:[#allocation23_spill]]  ;;  %s1827_s23 = smov %s1314_s24 }
 0x1d2   : > { %s1828_s24 = smov %s1318_s25  ;;  %s1829_s25 = smov %s1824_s30 }
 0x1d3   :  { %26 = sbr.rel (!%p24_p10) target bundleno = 13 (0xd), region = 122 }
 0x1da   :  { %707 = vsyncpa [#allocation5], 1 }
 0x1db   :  { %709 = vsyncpa [#allocation5 + $0x1], 1 }
 0x1dc   :  { %710 = vsyncpa [#allocation8], 1 }
 0x1dd   :  { %711 = vsyncpa [#allocation12], 1 }
 0x1de   :  { %713 = vsyncpa [#allocation12 + $0x1], 1 }
 0x1df   :  { %714 = vsyncpa [#allocation6], 1 }
 0x1e0   :  { %716 = vsyncpa [#allocation6 + $0x1], 1 }

</bundles_post_ra>
